<compile_context>
chip_gen: v6e
topology: v6e:2x2x1
jax: 0.10.0
libtpu: 0.0.40
codegen_flags: <defaults>
</compile_context>

<pallas_src>
import functools

import jax
import jax.numpy as jnp
from jax import lax
from jax.experimental import pallas as pl
from jax.experimental.pallas import tpu as pltpu


_VMEM_LIMIT = 48 * 1024 * 1024  # above the 32 MiB scoped default, below v7x's 64 MiB phys


def _round_up(x, m):
    return ((x + m - 1) // m) * m


# --------------------------------------------------------------------------------------
# Kernel 1: all-heads projection  Wh_all = h @ W_all   (row-tiled, one MXU matmul)
# --------------------------------------------------------------------------------------
def _proj_kernel(h_ref, w_ref, wh_ref):
    wh_ref[...] = jnp.dot(
        h_ref[...], w_ref[...], preferred_element_type=jnp.float32
    ).astype(wh_ref.dtype)


# --------------------------------------------------------------------------------------
# Kernel 2: row-tiled masked-softmax attention + aggregation for ALL heads
# --------------------------------------------------------------------------------------
def _attn_kernel(adj_ref, wh_ref, a1_ref, a2_ref, out_ref, *,
                 alpha, nheads, f_pad, n_real, activation):
    """
    adj_ref: (tm, N_pad) int8   -- adjacency rows of this tile (fetched once per tile)
    wh_ref : (N_pad, H*f_pad)   -- projected features, resident across the grid
    a1_ref : (H*f_pad, H)       -- column h holds a_h[:F] in head-h's 128-lane slab
    a2_ref : (H, H*f_pad)       -- row    h holds a_h[F:] in head-h's 128-lane slab
    out_ref: (tm, H*f_pad)      -- per-head outputs in 128-lane column slabs
    """
    tm = adj_ref.shape[0]
    n_pad = adj_ref.shape[1]
    i = pl.program_id(0)
    row0 = pl.multiple_of(i * tm, 8)

    wh_full = wh_ref[...]                                  # (N_pad, H*f_pad)
    wh_rows = wh_ref[pl.ds(row0, tm), :]                   # (tm,    H*f_pad)

    # per-query / per-key attention projections for all heads with two batched matmuls
    f1 = jnp.dot(wh_rows, a1_ref[...],
                 preferred_element_type=jnp.float32)       # (tm, H)
    f2 = lax.dot_general(a2_ref[...], wh_full,
                         dimension_numbers=(((1,), (1,)), ((), ())),
                         preferred_element_type=jnp.float32)   # (H, N_pad)

    adj_pos = adj_ref[...] > 0                             # (tm, N_pad) mask

    # masked-softmax "zero": real non-neighbors get -9e15 (like the reference); padded
    # key columns get float32-min so isolated rows normalise over the N real nodes.
    col = lax.broadcasted_iota(jnp.int32, (1, n_pad), 1)
    neg = jnp.where(col < n_real, jnp.float32(-9.0e15),
                    jnp.float32(jnp.finfo(jnp.float32).min))   # (1, N_pad)

    for hd in range(nheads):                               # static unroll, H is small
        c0 = hd * f_pad
        e = f1[:, hd:hd + 1] + f2[hd:hd + 1, :]            # (tm, N_pad)
        e = jnp.where(e > 0, e, alpha * e)                 # LeakyReLU(alpha)
        s = jnp.where(adj_pos, e, neg)
        s = s - jnp.max(s, axis=1, keepdims=True)
        p = jnp.exp(s)
        att = p * pl.reciprocal(jnp.sum(p, axis=1, keepdims=True), approx=True)
        # F.dropout(attention, ...) is identity in eval mode.

        wh_h = wh_full[:, c0:c0 + f_pad]                   # (N_pad, f_pad) static slice
        hp = jnp.dot(att.astype(wh_h.dtype), wh_h,
                     preferred_element_type=jnp.float32)   # (tm, f_pad)
        hp = jnp.where(hp > 0, hp, jnp.expm1(hp))          # ELU
        if activation == "elu_tanh":                       # out layer: GAT adds tanh
            hp = jnp.tanh(hp)
        out_ref[:, c0:c0 + f_pad] = hp.astype(out_ref.dtype)


# --------------------------------------------------------------------------------------
# Layer wrapper: 2 pallas_calls for ALL heads of a GraphAttentionLayer group
# --------------------------------------------------------------------------------------
def _gat_layer(h, adj_i8, w_all, a1, a2, *, alpha, nheads, f_pad, n_real,
               activation, tm, out_dtype):
    n_pad, f_in = h.shape
    f_tot = nheads * f_pad
    assert n_pad % tm == 0
    grid = (n_pad // tm,)
    cparams = pltpu.CompilerParams(
        dimension_semantics=("parallel",),     # independent row tiles -> megacore (v7x)
        vmem_limit_bytes=_VMEM_LIMIT)

    # kernel 1: Wh_all = h @ W_all (one matmul for all heads)
    wh = pl.pallas_call(
        _proj_kernel,
        out_shape=jax.ShapeDtypeStruct((n_pad, f_tot), h.dtype),
        grid=grid,
        in_specs=[pl.BlockSpec((tm, f_in), lambda i: (i, 0)),
                  pl.BlockSpec((f_in, f_tot), lambda i: (0, 0))],
        out_specs=pl.BlockSpec((tm, f_tot), lambda i: (i, 0)),
        compiler_params=cparams,
    )(h, w_all)

    # kernel 2: masked-softmax attention + aggregation for all heads, row tiled
    kernel = functools.partial(
        _attn_kernel, alpha=alpha, nheads=nheads, f_pad=f_pad,
        n_real=n_real, activation=activation)
    return pl.pallas_call(
        kernel,
        out_shape=jax.ShapeDtypeStruct((n_pad, f_tot), out_dtype),
        grid=grid,
        in_specs=[pl.BlockSpec((tm, n_pad), lambda i: (i, 0)),      # adj row tile (int8)
                  pl.BlockSpec((n_pad, f_tot), lambda i: (0, 0)),   # Wh, resident
                  pl.BlockSpec((f_tot, nheads), lambda i: (0, 0)),  # packed a[:F]
                  pl.BlockSpec((nheads, f_tot), lambda i: (0, 0))], # packed a[F:]
        out_specs=pl.BlockSpec((tm, f_tot), lambda i: (i, 0)),
        compiler_params=cparams,
    )(adj_i8, wh, a1, a2)


# --------------------------------------------------------------------------------------
# Weight packing (one-time layout plumbing, outside the kernels)
# --------------------------------------------------------------------------------------
def _pack_heads(ws, attn_vecs, f_out, f_pad, mxu_dtype):
    """Pack per-head W / a into lane-dense 128-wide head slabs (zero padded)."""
    nheads = len(ws)
    f_in = ws[0].shape[0]
    f_tot = nheads * f_pad
    w_all = jnp.zeros((f_in, f_tot), jnp.float32)
    a1 = jnp.zeros((f_tot, nheads), jnp.float32)
    a2 = jnp.zeros((nheads, f_tot), jnp.float32)
    for hd, (w, a) in enumerate(zip(ws, attn_vecs)):
        c0 = hd * f_pad
        w_all = w_all.at[:, c0:c0 + f_out].set(w)
        a1 = a1.at[c0:c0 + f_out, hd].set(a[:f_out, 0])
        a2 = a2.at[hd, c0:c0 + f_out].set(a[f_out:, 0])
    return w_all.astype(mxu_dtype), a1.astype(mxu_dtype), a2.astype(mxu_dtype)


def gat_forward(x, adj, params, *, alpha, mxu_dtype=jnp.bfloat16, f_pad=128):
    """GAT.forward in eval mode (all F.dropout calls are identity)."""
    n = x.shape[0]
    heads = params["attentions"]
    nheads = len(heads)
    nhid = heads[0][0].shape[1]
    w_out, a_out = params["out_att"]
    nclass = w_out.shape[1]

    # row tile / padding (padded rows & cols are masked out inside the kernel)
    tm = min(256, _round_up(max(n, 8), 8))
    n_pad = _round_up(n, tm)
    x_p = jnp.pad(x, ((0, n_pad - n), (0, 0))).astype(mxu_dtype)
    adj_i8 = jnp.pad((adj > 0).astype(jnp.int8), ((0, n_pad - n), (0, n_pad - n)))

    # pack head weights; out_att's weight rows are re-laid onto the padded head slabs
    w1, a1_1, a2_1 = _pack_heads([w for w, _ in heads], [a for _, a in heads],
                                 nhid, f_pad, mxu_dtype)
    w_out_r = jnp.zeros((nheads * f_pad, nclass), jnp.float32)
    for hd in range(nheads):
        w_out_r = w_out_r.at[hd * f_pad:hd * f_pad + nhid, :].set(
            w_out[hd * nhid:(hd + 1) * nhid, :])
    w2, a1_2, a2_2 = _pack_heads([w_out_r], [a_out], nclass, f_pad, mxu_dtype)

    # layer 1: all attention heads, ELU, implicit concat via 128-lane column slabs
    x1 = _gat_layer(x_p, adj_i8, w1, a1_1, a2_1, alpha=alpha, nheads=nheads,
                    f_pad=f_pad, n_real=n, activation="elu", tm=tm,
                    out_dtype=mxu_dtype)
    # layer 2: out_att (concat=False) with GAT-level ELU + tanh fused in-kernel
    out = _gat_layer(x1, adj_i8, w2, a1_2, a2_2, alpha=alpha, nheads=1,
                     f_pad=f_pad, n_real=n, activation="elu_tanh", tm=tm,
                     out_dtype=jnp.float32)
    return out[:n, :nclass]


# --------------------------------------------------------------------------------------
# Pure-JAX reference (mirror of the PyTorch module in eval mode) + init + demo
# --------------------------------------------------------------------------------------
def gat_reference(x, adj, params, *, alpha):
    def layer(h, w, a, concat):
        wh = h @ w
        f_out = w.shape[1]
        f1 = wh @ a[:f_out]                      # (N, 1)
        f2 = wh @ a[f_out:]                      # (N, 1)
        e = f1 + f2.T
        e = jnp.where(e > 0, e, alpha * e)
        att = jnp.where(adj > 0, e, jnp.float32(-9.0e15))
        att = jax.nn.softmax(att, axis=1)
        hp = att @ wh
        return jax.nn.elu(hp) if concat else hp

    h1 = jnp.concatenate([layer(x, w, a, True) for (w, a) in params["attentions"]],
                         axis=1)
    w_out, a_out = params["out_att"]
    return jnp.tanh(jax.nn.elu(layer(h1, w_out, a_out, False)))


def xavier_uniform(key, shape, gain=1.414):
    fan_in, fan_out = shape
    bound = gain * (6.0 / (fan_in + fan_out)) ** 0.5
    return jax.random.uniform(key, shape, jnp.float32, -bound, bound)


def init_gat_params(key, nfeat, nhid, nclass, nheads):
    params = {"attentions": [], "out_att": None}
    for _ in range(nheads):
        key, kw, ka = jax.random.split(key, 3)
        params["attentions"].append((xavier_uniform(kw, (nfeat, nhid)),
                                     xavier_uniform(ka, (2 * nhid, 1))))
    key, kw, ka = jax.random.split(key, 3)
    params["out_att"] = (xavier_uniform(kw, (nhid * nheads, nclass)),
                         xavier_uniform(ka, (2 * nclass, 1)))
    return params


if __name__ == "__main__":
    jax.config.update("jax_default_matmul_precision", "highest")

    N, nfeat, nhid, nclass, nheads = 16, 32, 16, 8, 2
    alpha = 0.2  # LeakyReLU slope; dropout unused in eval mode

    key = jax.random.PRNGKey(0)
    key, kx, kadj, kp = jax.random.split(key, 4)

    x = jax.random.normal(kx, (N, nfeat), dtype=jnp.float32)
    adj_rand = (jax.random.uniform(kadj, (N, N)) > 0.6).astype(jnp.float32)
    adj = jnp.clip(adj_rand + adj_rand.T + jnp.eye(N, dtype=jnp.float32), 0.0, 1.0)

    params = init_gat_params(kp, nfeat, nhid, nclass, nheads)
    ref = gat_reference(x, adj, params, alpha=alpha)

    # full-precision run: validates the fused/tiled structure against the reference
    out_f32 = jax.block_until_ready(
        gat_forward(x, adj, params, alpha=alpha, mxu_dtype=jnp.float32))
    assert out_f32.shape == (N, nclass)
    err_f32 = float(jnp.max(jnp.abs(out_f32 - ref)))
    assert err_f32 < 2e-2, f"f32 kernel mismatch vs reference: {err_f32}"

    # optimized run: bf16 MXU inputs (f32 accumulate / f32 softmax), the default path
    out_bf16 = jax.block_until_ready(
        gat_forward(x, adj, params, alpha=alpha, mxu_dtype=jnp.bfloat16))
    assert out_bf16.shape == (N, nclass)
    assert bool(jnp.all(jnp.isfinite(out_bf16)))
    assert float(jnp.max(jnp.abs(out_bf16 - ref))) < 0.3

    print("KERNEL_OK")
</pallas_src>

<mosaic_0001>
module attributes {stable_mosaic.version = 11 : i64} {
  func.func @_proj_kernel(%arg0: i32, %arg1: memref<16x32xf32, #tpu.memory_space<vmem>>, %arg2: memref<32x256xf32, #tpu.memory_space<vmem>>, %arg3: memref<16x256xf32, #tpu.memory_space<vmem>>) attributes {dimension_semantics = [#tpu.dimension_semantics<parallel>], iteration_bounds = array<i64: 1>, scalar_prefetch = 0 : i64, scratch_operands = 0 : i64, tpu.core_type = #tpu.core_type<tc>, window_params = [{transform_indices = @transform_0, window_bounds = array<i64: 16, 32>}, {pipeline_mode = #tpu.pipeline_mode<synchronous>, transform_indices = @transform_1, window_bounds = array<i64: 32, 256>}, {transform_indices = @transform_2, window_bounds = array<i64: 16, 256>}]} {
    %c0 = arith.constant 0 : index
    %c0_0 = arith.constant 0 : index
    %0 = vector.load %arg1[%c0, %c0_0] : memref<16x32xf32, #tpu.memory_space<vmem>>, vector<16x32xf32>
    %c0_1 = arith.constant 0 : index
    %c0_2 = arith.constant 0 : index
    %1 = vector.load %arg2[%c0_1, %c0_2] : memref<32x256xf32, #tpu.memory_space<vmem>>, vector<32x256xf32>
    %cst = arith.constant dense<0.000000e+00> : vector<16x256xf32>
    %2 = tpu.matmul %0, %1, %cst {dimension_numbers = #tpu.dot_dimension_numbers<[1], [0], [0], [1], [0, 0, 1, 1], [], []>, precision = #tpu.contract_precision<fp32>} : vector<16x32xf32>, vector<32x256xf32>, vector<16x256xf32> -> vector<16x256xf32>
    %c0_3 = arith.constant 0 : index
    %c0_4 = arith.constant 0 : index
    %3 = vector.load %arg3[%c0_3, %c0_4] : memref<16x256xf32, #tpu.memory_space<vmem>>, vector<16x256xf32>
    tpu.vector_store %arg3[%c0_3, %c0_4], %2 {strides = array<i32>} : memref<16x256xf32, #tpu.memory_space<vmem>>, vector<16x256xf32>,
    return
  }
  func.func @transform_0(%arg0: i32) -> (i32, i32) {
    %c0_i32 = arith.constant 0 : i32
    %c0_i32_0 = arith.constant 0 : i32
    return %arg0, %c0_i32 : i32, i32
  }
  func.func @transform_1(%arg0: i32) -> (i32, i32) {
    %c0_i32 = arith.constant 0 : i32
    %c0_i32_0 = arith.constant 0 : i32
    %c0_i32_1 = arith.constant 0 : i32
    return %c0_i32, %c0_i32_0 : i32, i32
  }
  func.func @transform_2(%arg0: i32) -> (i32, i32) {
    %c0_i32 = arith.constant 0 : i32
    %c0_i32_0 = arith.constant 0 : i32
    return %arg0, %c0_i32 : i32, i32
  }
}

</mosaic_0001>

<bundles_post_ra>
// kernel: tpu_custom_call.1
= control target key start
LH: loop header
LB: loop body
LE: loop exit
PB: predicated region body
PF: predicated region fallthrough
CT: control target
= control target key end

     0   :  { %7 = vsyncpa [#allocation3], 0  ;;  %s921_s0 = inlined_call_operand.hbm [shape: f32[16,32], index: 0, kind: input, shape index: {}]   ;;  %s922_s1 = inlined_call_operand.hbm [shape: f32[32,256], index: 1, kind: input, shape index: {}]   ;;  %s923_s2 = inlined_call_operand.hbm [shape: f32[16,256], index: 2, kind: output, shape index: {}]  }
   0x1   :  { %8 = vsyncpa [#allocation6], 0 }
   0x2   :  { %9 = vsyncpa [#allocation4], 0  ;;  %s745_s9 = smov [#allocation2]  }
   0x3   :  { %s15_s10 = sshll.u32 %s745_s9, 4  ;;  %s16_s10 = int_to_ptr.vmem [resolvable:$true] %s15_s10 }
   0x4   :  { %s687_s11 = scalar_lea.vmem %s16_s10, 256  ;;  %p692_p1 = scmp.lt.s32.totalorder %s16_s10, %s16_s10 }
   0x5   :  { %p688_p0 = scmp.ne.s32.totalorder %s16_s10, %s687_s11  ;;  %p693_p2 = scmp.lt.s32.totalorder %s687_s11, %s687_s11 }
   0x7   :  { %p694_p3 = por %p693_p2, %p692_p1 }
   0x9   :  { %p695_p4 = pnand %p694_p3, %p688_p0 }
   0xb   :  { %698 = shalt.err (!%p695_p4)
}
   0xc   :  { %s746_s12 = smov 128   ;;  %s747_s13 = smov 8  }
   0xd   :  { %21 = dma.hbm_to_vmem [thread:$0]  %s921_s0, 256, %s16_s10, [#allocation3], %s746_s12, %s746_s12, %s747_s13  }
   0xe   :  { %s748_s16 = smov [#allocation5]  }
   0xf   :  { %s27_s17 = sshll.u32 %s748_s16, 4  ;;  %s28_s17 = int_to_ptr.vmem [resolvable:$true] %s27_s17 }
  0x10   :  { %s707_s18 = scalar_lea.vmem %s28_s17, 1024  ;;  %p712_p6 = scmp.lt.s32.totalorder %s28_s17, %s28_s17 }
  0x11   :  { %p708_p5 = scmp.ne.s32.totalorder %s28_s17, %s707_s18  ;;  %p713_p7 = scmp.lt.s32.totalorder %s707_s18, %s707_s18 }
  0x13   :  { %p714_p8 = por %p713_p7, %p712_p6 }
  0x15   :  { %p715_p9 = pnand %p714_p8, %p708_p5 }
  0x17   :  { %718 = shalt.err (!%p715_p9)
}
  0x18   :  { %s749_s19 = smov 256   ;;  %s750_s20 = smov 16  }
  0x19   :  { %33 = dma.hbm_to_vmem [thread:$0]  %s922_s1, 1024, %s28_s17, [#allocation6], %s749_s19, %s749_s19, %s750_s20  }
  0x1a   :  { %739 = dma.done.wait [#allocation3], 256  }
  0x1b   :  { %740 = vsyncadd [#allocation3], 4294967040 }
  0x1c   :  { %741 = dma.done.wait [#allocation6], 1024  }
  0x1d   :  { %742 = vsyncadd [#allocation6], 4294966272  ;;  %v751_v0 = vmov 0.0   ;;  %v49_v1 = vld [vmem:[#allocation5 + $0x38] sm:$0xff]  ;;  %v48_v2 = vld [vmem:[#allocation5 + $0x30] sm:$0xff]  ;;  %vm50_vm0 = vcmask 261120  }
  0x1e   :  { %129 = vmatprep.mubr.f32.mxu0 %v751_v0  ;;  %256 = vmatprep.mubr.f32.mxu1 %v751_v0  ;;  %v47_v3 = vld [vmem:[#allocation5 + $0x28] sm:$0xff]  ;;  %v779_v4 = vand.u32 4294901760, %v49_v1  ;;  %v781_v5 = vand.u32 4294901760, %v48_v2  ;;  %v46_v7 = vld [vmem:[#allocation5 + $0x20] sm:$0xff]  ;;  %v45_v8 = vld [vmem:[#allocation5 + $0x18] sm:$0xff]  ;;  %s752_s0 = smov [#allocation7]  }
  0x1f   :  { %v783_v6 = vand.u32 4294901760, %v47_v3  ;;  %v44_v9 = vld [vmem:[#allocation5 + $0x10] sm:$0xff]  ;;  %v785_v10 = vand.u32 4294901760, %v46_v7  ;;  %v787_v11 = vand.u32 4294901760, %v45_v8  ;;  %v43_v13 = vld [vmem:[#allocation5 + $0x8] sm:$0xff]  ;;  %v42_v14 = vld [vmem:[#allocation5] sm:$0xff] }
  0x20   :  { %v789_v12 = vand.u32 4294901760, %v44_v9  ;;  %v40_v15 = vld [vmem:[#allocation2] sm:$0xff]  ;;  %82 = vmatprep.subr.mxu0 %v779_v4  ;;  %v792_v16 = vand.u32 4294901760, %v43_v13  ;;  %v795_v17 = vsub.f32 %v49_v1, %v779_v4  ;;  %v797_v18 = vand.u32 4294901760, %v42_v14  ;;  %v41_v20 = vld [vmem:[#allocation2 + $0x8] sm:$0xff]  ;;  %s658_s1 = sshll.u32 %s752_s0, 4  ;;  %s659_s1 = int_to_ptr.vmem [resolvable:$true] %s658_s1 }
  0x21   :  { %v800_v19 = vsub.f32 %v48_v2, %v781_v5  ;;  %84 = vmatpush1.msra.mxu0 %v781_v5  ;;  %v52_v21 = vsel %vm50_vm0, %v40_v15, 0  ;;  %v805_v22 = vsub.f32 %v47_v3, %v783_v6  ;;  %v808_v23 = vsub.f32 %v46_v7, %v785_v10  ;;  %s719_s23 = scalar_lea.vmem %s659_s1, 512  ;;  %p724_p11 = scmp.lt.s32.totalorder %s659_s1, %s659_s1 }
  0x22   :  { %v811_v24 = vsub.f32 %v45_v8, %v787_v11  ;;  %86 = vmatprep.subr.mxu0 %v783_v6  ;;  %v178_v25 = vand.u32 4294901760, %v795_v17  ;;  %v816_v27 = vand.u32 4294901760, %v52_v21  ;;  %v819_v28 = vsub.f32 %v44_v9, %v789_v12  ;;  %p720_p10 = scmp.ne.s32.totalorder %s659_s1, %s719_s23  ;;  %p725_p12 = scmp.lt.s32.totalorder %s719_s23, %s719_s23 }
  0x23   :  { %v184_v26 = vand.u32 4294901760, %v800_v19  ;;  %88 = vmatpush1.msra.mxu0 %v785_v10  ;;  %v190_v29 = vand.u32 4294901760, %v805_v22  ;;  %v196_v30 = vand.u32 4294901760, %v808_v23  ;;  %v55_v32 = vsel %vm50_vm0, %v41_v20, 0 }
  0x24   :  { %v202_v31 = vand.u32 4294901760, %v811_v24  ;;  %90 = vmatprep.subr.mxu0 %v787_v11  ;;  %v179_v33 = vsub.f32 %v795_v17, %v178_v25  ;;  %v834_v35 = vsub.f32 %v52_v21, %v816_v27  ;;  %v208_v36 = vand.u32 4294901760, %v819_v28  ;;  %p726_p13 = por %p725_p12, %p724_p11 }
  0x25   :  { %v185_v34 = vsub.f32 %v800_v19, %v184_v26  ;;  %92 = vmatpush1.msra.mxu0 %v789_v12  ;;  %v191_v37 = vsub.f32 %v805_v22, %v190_v29  ;;  %v197_v38 = vsub.f32 %v808_v23, %v196_v30  ;;  %v847_v40 = vand.u32 4294901760, %v55_v32 }
  0x26   :  { %v203_v39 = vsub.f32 %v811_v24, %v202_v31  ;;  %94 = vmatprep.subr.mxu0 %v792_v16  ;;  %v180_v41 = vand.u32 4294901760, %v179_v33  ;;  %v132_v43 = vand.u32 4294901760, %v834_v35  ;;  %v209_v44 = vsub.f32 %v819_v28, %v208_v36  ;;  %p727_p0 = pnand %p726_p13, %p720_p10 }
  0x27   :  { %v186_v42 = vand.u32 4294901760, %v185_v34  ;;  %96 = vmatpush1.msra.mxu0 %v797_v18  ;;  %v192_v45 = vand.u32 4294901760, %v191_v37  ;;  %v198_v46 = vand.u32 4294901760, %v197_v38  ;;  %v856_v47 = vsub.f32 %v55_v32, %v847_v40 }
  0x28   :  { %181 = vmatprep.subr.mxu1 %v180_v41  ;;  %v133_v48 = vsub.f32 %v834_v35, %v132_v43  ;;  %297 = vmatprep.subr.mxu0 %v795_v17  ;;  %v204_v49 = vand.u32 4294901760, %v203_v39  ;;  %v213_v50 = vsub.f32 %v43_v13, %v792_v16  ;;  %v219_v51 = vsub.f32 %v42_v14, %v797_v18 }
  0x29   :  { %187 = vmatpush1.msra.mxu1 %v186_v42  ;;  %v143_v52 = vand.u32 4294901760, %v856_v47  ;;  %v210_v54 = vand.u32 4294901760, %v209_v44 }
  0x2a   :  { %v134_v53 = vand.u32 4294901760, %v133_v48  ;;  %193 = vmatprep.subr.mxu1 %v192_v45  ;;  %v214_v55 = vand.u32 4294901760, %v213_v50  ;;  %v220_v56 = vand.u32 4294901760, %v219_v51 }
  0x2b   :  { %199 = vmatpush1.msra.mxu1 %v198_v46  ;;  %v144_v57 = vsub.f32 %v856_v47, %v143_v52 }
  0x2c   :  { %135 = vmatmul.mubr.f32.vlgmr.msra.gmra.mxu0 %v134_v53  ;;  %205 = vmatprep.subr.mxu1 %v204_v49  ;;  %v215_v58 = vsub.f32 %v213_v50, %v214_v55  ;;  %v221_v59 = vsub.f32 %v219_v51, %v220_v56 }
  0x2d   :  { %300 = vmatpush1.msra.mxu0 %v800_v19  ;;  %140 = vmatprep.mubr.f32.mxu0 %v751_v0  ;;  %v145_v60 = vand.u32 4294901760, %v144_v57 }
  0x2e   :  { %303 = vmatprep.subr.mxu0 %v805_v22  ;;  %211 = vmatpush1.msra.mxu1 %v210_v54  ;;  %v216_v61 = vand.u32 4294901760, %v215_v58  ;;  %v222_v62 = vand.u32 4294901760, %v221_v59 }
  0x2f   :  { %306 = vmatpush1.msra.mxu0 %v808_v23 }
  0x30   :  { %146 = vmatmul.mubr.f32.gmra.mxu0 %v145_v60  ;;  %217 = vmatprep.subr.mxu1 %v216_v61 }
  0x31   :  { %309 = vmatprep.subr.mxu0 %v811_v24  ;;  %223 = vmatpush1.msra.mxu1 %v222_v62 }
  0x32   :  { %312 = vmatpush1.msra.mxu0 %v819_v28  ;;  %258 = vmatmul.mubr.f32.vlgmr.msra.gmra.mxu1 %v816_v27 }
  0x33   :  { %315 = vmatprep.subr.mxu0 %v213_v50  ;;  %393 = vmatprep.subr.mxu1 %v779_v4 }
  0x34   :  { %318 = vmatpush1.msra.mxu0 %v219_v51  ;;  %351 = vmatprep.mubr.f32.mxu0 %v751_v0 }
  0x35   :  { %395 = vmatpush1.msra.mxu1 %v781_v5  ;;  %354 = vmatmul.mubr.f32.vlgmr.msra.gmra.mxu0 %v834_v35 }
  0x36   :  { %397 = vmatprep.subr.mxu1 %v783_v6  ;;  %486 = vmatprep.subr.mxu0 %v178_v25 }
  0x37   :  { %263 = vmatprep.mubr.f32.mxu1 %v751_v0  ;;  %399 = vmatpush1.msra.mxu1 %v785_v10 }
  0x38   :  { %490 = vmatpush1.msra.mxu0 %v184_v26  ;;  %265 = vmatmul.mubr.f32.gmra.mxu1 %v847_v40 }
  0x39   :  { %401 = vmatprep.subr.mxu1 %v787_v11  ;;  %494 = vmatprep.subr.mxu0 %v190_v29 }
  0x3a   :  { %359 = vmatprep.mubr.f32.mxu0 %v751_v0  ;;  %403 = vmatpush1.msra.mxu1 %v789_v12 }
  0x3b   :  { %498 = vmatpush1.msra.mxu0 %v196_v30  ;;  %405 = vmatprep.subr.mxu1 %v792_v16 }
  0x3c   :  { %362 = vmatmul.mubr.f32.gmra.mxu0 %v856_v47  ;;  %502 = vmatprep.subr.mxu0 %v202_v31 }
  0x3d   :  { %407 = vmatpush1.msra.mxu1 %v797_v18  ;;  %440 = vmatprep.mubr.f32.mxu1 %v751_v0 }
  0x3e   :  { %506 = vmatpush1.msra.mxu0 %v208_v36  ;;  %444 = vmatmul.mubr.f32.vlgmr.msra.gmra.mxu1 %v132_v43 }
  0x3f   :  { %510 = vmatprep.subr.mxu0 %v214_v55  ;;  %587 = vmatprep.subr.mxu1 %v779_v4 }
  0x40   :  { %514 = vmatpush1.msra.mxu0 %v220_v56  ;;  %547 = vmatprep.mubr.f32.mxu0 %v751_v0 }
  0x41   :  { %589 = vmatpush1.msra.mxu1 %v781_v5  ;;  %549 = vmatmul.mubr.f32.vlgmr.msra.gmra.mxu0 %v816_v27 }
  0x42   :  { %591 = vmatprep.subr.mxu1 %v783_v6  ;;  %449 = vmatprep.mubr.f32.mxu1 %v751_v0 }
  0x43   :  { %593 = vmatpush1.msra.mxu1 %v785_v10  ;;  %554 = vmatprep.mubr.f32.mxu0 %v751_v0 }
  0x44   :  { %453 = vmatmul.mubr.f32.gmra.mxu1 %v143_v52  ;;  %595 = vmatprep.subr.mxu1 %v787_v11 }
  0x45   :  { %597 = vmatpush1.msra.mxu1 %v789_v12  ;;  %556 = vmatmul.mubr.f32.gmra.mxu0 %v847_v40 }
  0x46   :  { %599 = vmatprep.subr.mxu1 %v792_v16  ;;  %634 = vmatprep.mubr.f32.mxu1 %v751_v0 }
  0x47   :  { %601 = vmatpush1.msra.mxu1 %v797_v18 }
  0x48   :  { %636 = vmatmul.mubr.f32.vlgmr.msra.gmra.mxu1 %v816_v27 }
  0x49   :  { %641 = vmatprep.mubr.f32.mxu1 %v751_v0 }
  0x4c   :  { %643 = vmatmul.mubr.f32.gmra.mxu1 %v847_v40 }
  0xec   :  { %v136_v63 = vpop.f32.mrf.mxu0 }
  0xee   :  { %v138_v1 = vpop.f32.mrf.mxu0 }
  0xf0   :  { %v147_v2 = vpop.f32.mrf.mxu0 }
  0xf2   :  { %v149_v3 = vpop.f32.mrf.mxu0  ;;  %v259_v4 = vpop.f32.mrf.mxu1 }
  0xf3   :  { %v260_v11 = vadd.f32 %v259_v4, %v136_v63 }
  0xf4   :  { %v261_v5 = vpop.f32.mrf.mxu1 }
  0xf5   :  { %v355_v6 = vpop.f32.mrf.mxu0  ;;  %v262_v14 = vadd.f32 %v261_v5, %v138_v1 }
  0xf6   :  { %v356_v16 = vadd.f32 %v355_v6, %v260_v11 }
  0xf7   :  { %v357_v8 = vpop.f32.mrf.mxu0 }
  0xf8   :  { %v266_v7 = vpop.f32.mrf.mxu1  ;;  %v358_v18 = vadd.f32 %v357_v8, %v262_v14 }
  0xf9   :  { %v267_v0 = vadd.f32 %v266_v7, %v147_v2 }
  0xfa   :  { %v268_v9 = vpop.f32.mrf.mxu1 }
  0xfb   :  { %v269_v19 = vadd.f32 %v268_v9, %v149_v3 }
  0xfc   :  { %v363_v10 = vpop.f32.mrf.mxu0 }
  0xfd   :  { %v364_v23 = vadd.f32 %v363_v10, %v267_v0 }
  0xfe   :  { %v365_v12 = vpop.f32.mrf.mxu0  ;;  %v445_v13 = vpop.f32.mrf.mxu1 }
  0xff   :  { %v446_v20 = vadd.f32 %v445_v13, %v356_v16  ;;  %v366_v27 = vadd.f32 %v365_v12, %v269_v19 }
 0x100   :  { %v447_v15 = vpop.f32.mrf.mxu1 }
 0x101   :  { %v550_v17 = vpop.f32.mrf.mxu0  ;;  %v448_v24 = vadd.f32 %v447_v15, %v358_v18 }
 0x102   :  { %v551_v28 = vadd.f32 %v550_v17, %v446_v20 }
 0x103   :  { %v552_v21 = vpop.f32.mrf.mxu0 }
 0x104   :  { %v454_v22 = vpop.f32.mrf.mxu1  ;;  %v553_v31 = vadd.f32 %v552_v21, %v448_v24 }
 0x105   :  { %v557_v26 = vpop.f32.mrf.mxu0  ;;  %v455_v29 = vadd.f32 %v454_v22, %v364_v23 }
 0x106   :  { %v456_v25 = vpop.f32.mrf.mxu1 }
 0x107   :  { %v457_v32 = vadd.f32 %v456_v25, %v366_v27  ;;  %v559_v34 = vpop.f32.mrf.mxu0  ;;  %v558_v36 = vadd.f32 %v557_v26, %v455_v29 }
 0x108   :  { %v637_v30 = vpop.f32.mrf.mxu1 }
 0x109   :  { %v638_v33 = vadd.f32 %v637_v30, %v551_v28  ;;  %v560_v39 = vadd.f32 %v559_v34, %v457_v32 }
 0x10a   :  { %v639_v35 = vpop.f32.mrf.mxu1 }
 0x10b   :  { %649 = vst [vmem:[#allocation7] sm:$0xff] %v638_v33  ;;  %v640_v37 = vadd.f32 %v639_v35, %v553_v31 }
 0x10c   :  { %v644_v38 = vpop.f32.mrf.mxu1 }
 0x10d   :  { %650 = vst [vmem:[#allocation7 + $0x8] sm:$0xff] %v640_v37  ;;  %v645_v40 = vadd.f32 %v644_v38, %v558_v36 }
 0x10e   :  { %v646_v41 = vpop.f32.mrf.mxu1 }
 0x10f   :  { %651 = vst [vmem:[#allocation7 + $0x10] sm:$0xff] %v645_v40  ;;  %v647_v42 = vadd.f32 %v646_v41, %v560_v39 }
 0x111   :  { %652 = vst [vmem:[#allocation7 + $0x18] sm:$0xff] %v647_v42 }
 0x112   :  { %730 = shalt.err (!%p727_p0)
}
 0x113   :  { %664 = dma.vmem_to_hbm [thread:$0]  %s659_s1, 512, %s923_s2, [#allocation4], %s749_s19, %s749_s19, %s750_s20  }
 0x114   :  { %743 = dma.done.wait [#allocation4], 512  }
 0x115   :  { %744 = vsyncadd [#allocation4], 4294966784 }
 0x116   :  { %668 = vsyncpa [#allocation3], 1 }
 0x117   :  { %669 = vsyncpa [#allocation6], 1 }
 0x118   :  { %670 = vsyncpa [#allocation4], 1 }

</bundles_post_ra>
